<compile_context>
chip_gen: v6e
topology: v6e:2x2x1
jax: 0.10.0
libtpu: 0.0.40
codegen_flags: <defaults>
</compile_context>

<pallas_src>
import functools

import jax
import jax.numpy as jnp
from jax.experimental import pallas as pl
from jax.experimental.pallas import tpu as pltpu

LANES = 128
_MIB = 1024 * 1024


def _cdiv(a, b):
    return -(-a // b)


def _hw_tuning():
    """Returns (target bytes per input block, default number of parallel chunks)."""
    block_bytes, num_chunks = 2 * _MIB, 1          # v5e / v6e / unknown: single TC
    try:
        info = pltpu.get_tpu_info()
        vmem = getattr(info, "vmem_capacity_bytes", None)
        if vmem is not None and vmem <= 64 * _MIB:
            # v7x: 2 TensorCores, ~3.2 TB/s HBM per core -> bigger blocks and
            # split the reduction across the two cores.
            block_bytes, num_chunks = 4 * _MIB, 2
    except Exception:
        pass
    return block_bytes, num_chunks


def _accumulate_strips(x_ref, y_ref, acc_ref, *, eps, strips, acc_rows):
    """Charbonnier-accumulate a list of row strips of the current block.

    `strips` is a sequence of (row_offset, n_rows, n_valid_rows_or_None); all
    entries are Python ints, so slice offsets and mask bounds are compile-time
    constants (static, aligned `pl.ds`, constant-bound compare for the single
    ragged strip).
    """
    for off, srows, valid in strips:
        xs = x_ref[pl.ds(off, srows), :].astype(jnp.float32)
        ys = y_ref[pl.ds(off, srows), :].astype(jnp.float32)
        d = xs - ys
        v = jnp.sqrt(d * d + jnp.float32(eps))
        if valid is not None:                              # ragged strip only
            row = jax.lax.broadcasted_iota(jnp.int32, v.shape, 0)
            v = jnp.where(row < valid, v, 0.0)
        if srows != acc_rows:                              # pure VALU vreg-add tree
            v = jnp.sum(v.reshape(srows // acc_rows, acc_rows, LANES), axis=0)
        acc_ref[...] += v


def _charbonnier_kernel(x_ref, y_ref, out_ref, acc_ref, *, eps, acc_rows,
                        full_strips, ragged_strips, steps_per_chunk,
                        first_partial, gate):
    c = pl.program_id(0)   # parallel chunk index
    i = pl.program_id(1)   # reduction step within the chunk

    @pl.when(i == 0)
    def _():
        acc_ref[...] = jnp.zeros_like(acc_ref)

    accumulate = functools.partial(_accumulate_strips, x_ref, y_ref, acc_ref,
                                   eps=eps, acc_rows=acc_rows)

    if not gate:
        accumulate(strips=full_strips)                     # common fast path
    else:
        block = c * steps_per_chunk + i

        @pl.when(block < first_partial)                    # full blocks: no masking
        def _():
            accumulate(strips=full_strips)

        if ragged_strips:                                  # the single ragged block
            @pl.when(block == first_partial)
            def _():
                accumulate(strips=ragged_strips)
        # block > first_partial: clamped duplicate produced by the grid
        # over-run; contributes nothing, skip all compute.

    @pl.when(i == steps_per_chunk - 1)
    def _():
        out_ref[0, 0] = jnp.sum(acc_ref[...])              # one cross-lane reduce / chunk


def charbonnier_loss(x: jax.Array, y: jax.Array, eps: float = 1e-9,
                     tile_rows: int | None = None,
                     num_chunks: int | None = None) -> jax.Array:
    assert x.shape == y.shape, "x and y must have the same shape"
    n_elems = x.size
    itemsize = x.dtype.itemsize

    xf = x.reshape(-1)
    yf = y.reshape(-1)
    rows = n_elems // LANES
    rem = n_elems % LANES

    # <=127-element lane tail: summed in plain jnp (no whole-tensor pad copy).
    tail_sum = jnp.float32(0.0)
    if rem:
        xt = xf[rows * LANES:].astype(jnp.float32)
        yt = yf[rows * LANES:].astype(jnp.float32)
        dt = xt - yt
        tail_sum = jnp.sum(jnp.sqrt(dt * dt + jnp.float32(eps)))

    if rows == 0:
        return tail_sum / jnp.float32(n_elems)

    # TODO(synk): when n_elems % 128 != 0 the prefix slice below may still
    # materialize a copy in XLA; a manual pl.ANY + make_async_copy path would
    # avoid it for that (rare) case.
    x2d = xf[: rows * LANES].reshape(rows, LANES)
    y2d = yf[: rows * LANES].reshape(rows, LANES)

    block_bytes, chunks_default = _hw_tuning()
    if num_chunks is None:
        num_chunks = chunks_default
    if tile_rows is None:
        tile_rows = block_bytes // (LANES * itemsize)      # ~2 MiB (4 MiB on v7x) / input block
    tile_rows = max(8, min(int(tile_rows), 16384))

    if rows <= tile_rows:
        tile_rows = rows            # single block == full array dim (always legal)
    else:
        tile_rows = max(8, tile_rows - tile_rows % 8)

    total_steps = _cdiv(rows, tile_rows)
    num_chunks_eff = max(1, min(int(num_chunks), total_steps))
    steps_per_chunk = _cdiv(total_steps, num_chunks_eff)
    last_block = total_steps - 1

    # Accumulator / strip geometry (all compile-time constants).
    if tile_rows % 8 == 0:
        acc_rows = 8
        strip_rows = next(c for c in (256, 128, 64, 32, 16, 8)
                          if tile_rows % c == 0)
    else:
        acc_rows = tile_rows        # tiny array: accumulate the block directly
        strip_rows = tile_rows
    n_strips = tile_rows // strip_rows
    full_strips = tuple((s * strip_rows, strip_rows, None) for s in range(n_strips))

    first_partial = rows // tile_rows        # first block containing any garbage row
    has_ragged = rows % tile_rows != 0
    has_overrun = num_chunks_eff * steps_per_chunk != total_steps
    gate = has_ragged or has_overrun

    ragged_strips = ()
    if has_ragged:
        base = first_partial * tile_rows
        rs = []
        for s in range(n_strips):
            start = s * strip_rows
            gstart = base + start
            if gstart >= rows:
                break                        # remaining strips are pure garbage: skip
            if gstart + strip_rows <= rows:
                rs.append((start, strip_rows, None))
            else:
                rs.append((start, strip_rows, rows - gstart))
        ragged_strips = tuple(rs)

    if has_overrun:
        def in_map(c, i):
            # Over-run steps of the last chunk re-read a valid block; the
            # kernel skips their compute entirely.
            return (jnp.minimum(c * steps_per_chunk + i, last_block), 0)
    else:
        def in_map(c, i):
            return (c * steps_per_chunk + i, 0)

    kernel = functools.partial(
        _charbonnier_kernel,
        eps=float(eps), acc_rows=acc_rows,
        full_strips=full_strips, ragged_strips=ragged_strips,
        steps_per_chunk=steps_per_chunk, first_partial=first_partial,
        gate=gate)

    n_main = rows * LANES
    cost = pl.CostEstimate(
        flops=5 * n_main,
        transcendentals=n_main,
        bytes_accessed=2 * n_main * itemsize + 4 * num_chunks_eff)

    partials = pl.pallas_call(
        kernel,
        out_shape=jax.ShapeDtypeStruct((num_chunks_eff, 1), jnp.float32),
        grid_spec=pltpu.PrefetchScalarGridSpec(
            num_scalar_prefetch=0,
            grid=(num_chunks_eff, steps_per_chunk),
            in_specs=[
                pl.BlockSpec((tile_rows, LANES), in_map),
                pl.BlockSpec((tile_rows, LANES), in_map),
            ],
            out_specs=pl.BlockSpec((1, 1), lambda c, i: (c, 0),
                                   memory_space=pltpu.SMEM),
            scratch_shapes=[pltpu.VMEM((acc_rows, LANES), jnp.float32)],
        ),
        compiler_params=pltpu.CompilerParams(
            dimension_semantics=("parallel", "arbitrary"),
            vmem_limit_bytes=32 * _MIB),
        cost_estimate=cost,
    )(x2d, y2d)

    return (jnp.sum(partials) + tail_sum) / jnp.float32(n_elems)


def charbonnier_loss_ref(x, y, eps=1e-9):
    diff = x.astype(jnp.float32) - y.astype(jnp.float32)
    return jnp.mean(jnp.sqrt(diff * diff + eps))


if __name__ == "__main__":
    key = jax.random.PRNGKey(0)

    tests = [
        # (shape (NCHW), dtype, kwargs)
        ((2, 4, 16, 16), jnp.float32, {}),                    # lane-aligned, single block
        ((2, 11, 32, 32), jnp.float32,
         dict(tile_rows=64, num_chunks=2)),                   # ragged block + over-run + chunk split
        ((2, 3, 15, 17), jnp.float32, {}),                    # <128-element lane tail (jnp path)
        ((2, 8, 96, 96), jnp.float32, {}),                    # multi-strip single block
        ((2, 4, 16, 16), jnp.bfloat16, {}),                   # in-kernel dtype cast
    ]

    for t, (shape, dtype, kw) in enumerate(tests):
        kx, ky = jax.random.split(jax.random.fold_in(key, t))
        x = jax.random.normal(kx, shape, dtype=jnp.float32).astype(dtype)
        y = jax.random.normal(ky, shape, dtype=jnp.float32).astype(dtype)

        loss = charbonnier_loss(x, y, **kw)
        jax.block_until_ready(loss)

        ref = charbonnier_loss_ref(x, y)
        assert jnp.allclose(loss, ref, rtol=1e-5, atol=1e-6), (shape, dtype, loss, ref)

    print("KERNEL_OK")
</pallas_src>

<mosaic_0001>
module attributes {stable_mosaic.version = 11 : i64} {
  func.func @_charbonnier_kernel(%arg0: i32, %arg1: i32, %arg2: memref<16x128xf32, #tpu.memory_space<vmem>>, %arg3: memref<16x128xf32, #tpu.memory_space<vmem>>, %arg4: memref<1x1xf32, #tpu.memory_space<smem>>, %arg5: memref<8x128xf32, #tpu.memory_space<vmem>>) attributes {dimension_semantics = [#tpu.dimension_semantics<parallel>, #tpu.dimension_semantics<arbitrary>], iteration_bounds = array<i64: 1, 1>, scalar_prefetch = 0 : i64, scratch_operands = 1 : i64, tpu.core_type = #tpu.core_type<tc>, window_params = [{transform_indices = @transform_0, window_bounds = array<i64: 16, 128>}, {transform_indices = @transform_1, window_bounds = array<i64: 16, 128>}, {transform_indices = @transform_2, window_bounds = array<i64: 1, 1>}]} {
    %c0_i32 = arith.constant 0 : i32
    %0 = arith.cmpi eq, %arg1, %c0_i32 : i32
    %1 = arith.extui %0 : i1 to i32
    %c0_i32_0 = arith.constant 0 : i32
    %2 = arith.cmpi ne, %1, %c0_i32_0 : i32
    scf.if %2 {
      %cst_11 = arith.constant 0.000000e+00 : f32
      %18 = vector.broadcast %cst_11 : f32 to vector<8x128xf32>
      %c0_12 = arith.constant 0 : index
      %c0_13 = arith.constant 0 : index
      %19 = vector.load %arg5[%c0_12, %c0_13] : memref<8x128xf32, #tpu.memory_space<vmem>>, vector<8x128xf32>
      tpu.vector_store %arg5[%c0_12, %c0_13], %18 {strides = array<i32>} : memref<8x128xf32, #tpu.memory_space<vmem>>, vector<8x128xf32>,
    } else {
    }
    %c0 = arith.constant 0 : index
    %c0_1 = arith.constant 0 : index
    %3 = vector.load %arg2[%c0, %c0_1] : memref<16x128xf32, #tpu.memory_space<vmem>>, vector<16x128xf32>
    %c0_2 = arith.constant 0 : index
    %c0_3 = arith.constant 0 : index
    %4 = vector.load %arg3[%c0_2, %c0_3] : memref<16x128xf32, #tpu.memory_space<vmem>>, vector<16x128xf32>
    %5 = arith.subf %3, %4 : vector<16x128xf32>
    %6 = arith.mulf %5, %5 : vector<16x128xf32>
    %cst = arith.constant 9.99999971E-10 : f32
    %7 = vector.broadcast %cst : f32 to vector<16x128xf32>
    %8 = arith.addf %6, %7 : vector<16x128xf32>
    %9 = math.sqrt %8 : vector<16x128xf32>
    %10 = vector.shape_cast %9 : vector<16x128xf32> to vector<2x8x128xf32>
    %cst_4 = arith.constant dense<0.000000e+00> : vector<8x128xf32>
    %11 = vector.multi_reduction <add>, %10, %cst_4 [0] : vector<2x8x128xf32> to vector<8x128xf32>
    %c0_5 = arith.constant 0 : index
    %c0_6 = arith.constant 0 : index
    %12 = vector.load %arg5[%c0_5, %c0_6] : memref<8x128xf32, #tpu.memory_space<vmem>>, vector<8x128xf32>
    %13 = arith.addf %12, %11 : vector<8x128xf32>
    %c0_7 = arith.constant 0 : index
    %c0_8 = arith.constant 0 : index
    %14 = vector.load %arg5[%c0_7, %c0_8] : memref<8x128xf32, #tpu.memory_space<vmem>>, vector<8x128xf32>
    tpu.vector_store %arg5[%c0_7, %c0_8], %13 {strides = array<i32>} : memref<8x128xf32, #tpu.memory_space<vmem>>, vector<8x128xf32>,
    %c0_i32_9 = arith.constant 0 : i32
    %15 = arith.cmpi eq, %arg1, %c0_i32_9 : i32
    %16 = arith.extui %15 : i1 to i32
    %c0_i32_10 = arith.constant 0 : i32
    %17 = arith.cmpi ne, %16, %c0_i32_10 : i32
    scf.if %17 {
      %c0_11 = arith.constant 0 : index
      %c0_12 = arith.constant 0 : index
      %18 = vector.load %arg5[%c0_11, %c0_12] : memref<8x128xf32, #tpu.memory_space<vmem>>, vector<8x128xf32>
      %19 = vector.shape_cast %18 : vector<8x128xf32> to vector<1x8x128xf32>
      %cst_13 = arith.constant dense<0.000000e+00> : vector<1xf32>
      %20 = vector.multi_reduction <add>, %19, %cst_13 [1, 2] : vector<1x8x128xf32> to vector<1xf32>
      %21 = vector.shape_cast %20 : vector<1xf32> to vector<1x1x1xf32>
      %22 = vector.extract %21[0, 0, 0] : f32 from vector<1x1x1xf32>
      %c0_14 = arith.constant 0 : index
      %c0_15 = arith.constant 0 : index
      %23 = memref.load %arg4[%c0_14, %c0_15] : memref<1x1xf32, #tpu.memory_space<smem>>
      memref.store %22, %arg4[%c0_14, %c0_15] : memref<1x1xf32, #tpu.memory_space<smem>>
    } else {
    }
    return
  }
  func.func @transform_0(%arg0: i32, %arg1: i32) -> (i32, i32) {
    %c1_i32 = arith.constant 1 : i32
    %0 = arith.muli %arg0, %c1_i32 : i32
    %1 = arith.addi %0, %arg1 : i32
    %c0_i32 = arith.constant 0 : i32
    %c0_i32_0 = arith.constant 0 : i32
    return %1, %c0_i32 : i32, i32
  }
  func.func @transform_1(%arg0: i32, %arg1: i32) -> (i32, i32) {
    %c1_i32 = arith.constant 1 : i32
    %0 = arith.muli %arg0, %c1_i32 : i32
    %1 = arith.addi %0, %arg1 : i32
    %c0_i32 = arith.constant 0 : i32
    %c0_i32_0 = arith.constant 0 : i32
    return %1, %c0_i32 : i32, i32
  }
  func.func @transform_2(%arg0: i32, %arg1: i32) -> (i32, i32) {
    %c0_i32 = arith.constant 0 : i32
    %c0_i32_0 = arith.constant 0 : i32
    return %arg0, %c0_i32 : i32, i32
  }
}

</mosaic_0001>

<bundles_post_ra>
// kernel: tpu_custom_call.1
= control target key start
LH: loop header
LB: loop body
LE: loop exit
PB: predicated region body
PF: predicated region fallthrough
CT: control target
= control target key end

     0   :  { %7 = vsyncpa [#allocation4], 0  ;;  %s209_s0 = inlined_call_operand.hbm [shape: f32[16,128], index: 0, kind: input, shape index: {}]   ;;  %s210_s1 = inlined_call_operand.hbm [shape: f32[16,128], index: 1, kind: input, shape index: {}]   ;;  %s211_s2 = inlined_call_operand.hbm [shape: f32[1,1], index: 2, kind: output, shape index: {}]  }
   0x1   :  { %8 = vsyncpa [#allocation7], 0 }
   0x2   :  { %9 = vsyncpa [#allocation5], 0  ;;  %s180_s9 = smov [#allocation3]  }
   0x3   :  { %s19_s10 = sshll.u32 %s180_s9, 4  ;;  %s20_s10 = int_to_ptr.vmem [resolvable:$true] %s19_s10 }
   0x4   :  { %s134_s11 = scalar_lea.vmem %s20_s10, 256  ;;  %p139_p1 = scmp.lt.s32.totalorder %s20_s10, %s20_s10 }
   0x5   :  { %p135_p0 = scmp.ne.s32.totalorder %s20_s10, %s134_s11  ;;  %p140_p2 = scmp.lt.s32.totalorder %s134_s11, %s134_s11 }
   0x7   :  { %p141_p3 = por %p140_p2, %p139_p1 }
   0x9   :  { %p142_p4 = pnand %p141_p3, %p135_p0 }
   0xb   :  { %145 = shalt.err (!%p142_p4)
}
   0xc   :  { %s181_s12 = smov 128   ;;  %s182_s13 = smov 8  }
   0xd   :  { %25 = dma.hbm_to_vmem [thread:$0]  %s209_s0, 256, %s20_s10, [#allocation4], %s181_s12, %s181_s12, %s182_s13  }
   0xe   :  { %s183_s16 = smov [#allocation6]  }
   0xf   :  { %s35_s17 = sshll.u32 %s183_s16, 4  ;;  %s36_s17 = int_to_ptr.vmem [resolvable:$true] %s35_s17 }
  0x10   :  { %s154_s18 = scalar_lea.vmem %s36_s17, 256  ;;  %p159_p6 = scmp.lt.s32.totalorder %s36_s17, %s36_s17 }
  0x11   :  { %p155_p5 = scmp.ne.s32.totalorder %s36_s17, %s154_s18  ;;  %p160_p7 = scmp.lt.s32.totalorder %s154_s18, %s154_s18 }
  0x13   :  { %p161_p8 = por %p160_p7, %p159_p6 }
  0x15   :  { %p162_p9 = pnand %p161_p8, %p155_p5 }
  0x17   :  { %165 = shalt.err (!%p162_p9)
}
  0x18   :  { %41 = dma.hbm_to_vmem [thread:$0]  %s210_s1, 256, %s36_s17, [#allocation7], %s181_s12, %s181_s12, %s182_s13  }
  0x19   :  { %174 = dma.done.wait [#allocation4], 256  }
  0x1a   :  { %175 = vsyncadd [#allocation4], 4294967040 }
  0x1b   :  { %176 = dma.done.wait [#allocation7], 256  }
  0x1c   :  { %177 = vsyncadd [#allocation7], 4294967040  ;;  %v57_v0 = vld [vmem:[#allocation3] sm:$0xff]  ;;  %v58_v1 = vld [vmem:[#allocation3 + $0x8] sm:$0xff]  ;;  %s184_s1 = smov [#allocation8]  }
  0x1d   :  { %v59_v2 = vld [vmem:[#allocation6] sm:$0xff]  ;;  %v60_v3 = vld [vmem:[#allocation6 + $0x8] sm:$0xff] }
  0x1e   :  { %v61_v4 = vsub.f32 %v57_v0, %v59_v2  ;;  %v62_v5 = vsub.f32 %v58_v1, %v60_v3 }
  0x20   :  { %v63_v6 = vmul.f32 %v61_v4, %v61_v4  ;;  %v64_v7 = vmul.f32 %v62_v5, %v62_v5 }
  0x22   :  { %v65_v8 = vadd.f32 1e-09, %v63_v6  ;;  %v66_v9 = vadd.f32 1e-09, %v64_v7 }
  0x24   :  { %122 = vrsqrt.f32 %v65_v8  ;;  %vm69_vm0 = vcmp.eq.f32.partialorder %v65_v8, inf  ;;  %v72_v11 = vand.u32 2147483648, %v65_v8  ;;  %vm71_vm1 = vcmp.eq.f32.partialorder %v65_v8, 0.0 }
  0x25   :  { %124 = vrsqrt.f32 %v66_v9  ;;  %vm76_vm2 = vcmp.eq.f32.partialorder %v66_v9, inf  ;;  %v79_v14 = vand.u32 2147483648, %v66_v9  ;;  %vm78_vm3 = vcmp.eq.f32.partialorder %v66_v9, 0.0 }
  0x31   :  { %v123_v10 = vpop.eup %122 }
  0x32   :  { %v125_v12 = vpop.eup %124  ;;  %v68_v13 = vmul.f32 %v123_v10, %v65_v8 }
  0x33   :  { %v75_v15 = vmul.f32 %v125_v12, %v66_v9 }
  0x34   :  { %v70_v16 = vsel %vm69_vm0, %v65_v8, %v68_v13 }
  0x35   :  { %v73_v17 = vsel %vm71_vm1, %v72_v11, %v70_v16  ;;  %v77_v18 = vsel %vm76_vm2, %v66_v9, %v75_v15 }
  0x36   :  { %v80_v19 = vsel %vm78_vm3, %v79_v14, %v77_v18 }
  0x37   :  { %v81_v20 = vadd.f32 %v80_v19, %v73_v17 }
  0x39   :  { %89 = vadd.xlane.f32.xlu0 %v81_v20 }
  0xc2   :  { %v90_v21 = vpop.xlane.xlu0 %89 }
  0xc3   :  { %v91_v22 = vrot.slane %v90_v21, 4 }
  0xc5   :  { %v92_v23 = vadd.f32 %v91_v22, %v90_v21 }
  0xc7   :  { %v93_v24 = vrot.slane %v92_v23, 2 }
  0xc9   :  { %v94_v25 = vadd.f32 %v93_v24, %v92_v23 }
  0xcb   :  { %v95_v26 = vrot.slane %v94_v25, 1 }
  0xcd   :  { %v96_v27 = vadd.f32 %v95_v26, %v94_v25 }
  0xcf   :  { %115 = vpush %v96_v27 }
 0x100   :  { %s116_s0 = spop %115 }
 0x101   :  { %99 = sst [smem:[#allocation8]] %s116_s0 }
 0x102   :  { %107 = dma.smem_to_hbm %s184_s1, 16, %s211_s2, [#allocation5]  }
 0x103   :  { %178 = dma.done.wait [#allocation5], 16  }
 0x104   :  { %179 = vsyncadd [#allocation5], 4294967280 }
 0x105   :  { %111 = sfence }
 0x106   :  { %112 = vsyncpa [#allocation4], 1 }
 0x107   :  { %113 = vsyncpa [#allocation7], 1 }
 0x108   :  { %114 = vsyncpa [#allocation5], 1 }

</bundles_post_ra>
